<compile_context>
chip_gen: v7x
topology: tpu7x:2x2x1
jax: 0.10.0
libtpu: 0.0.40
codegen_flags: <defaults>
</compile_context>

<pallas_src>
import functools

import jax
import jax.numpy as jnp
from jax.experimental import pallas as pl
from jax.experimental.pallas import tpu as pltpu

LANE = 128      # TPU lane width
SUBLANE = 8     # TPU sublane width


def _round_up(n, m):
    return pl.cdiv(n, m) * m


def _coupling_kernel(x_ref, mask_ref, w1_ref, b1_ref, w2_ref, b2_ref,
                     z_ref, ld_ref):
    x_in = x_ref[...]                        # (TB, Dp) io dtype (f32 or bf16)
    x = x_in.astype(jnp.float32)
    mask = mask_ref[...]                     # (1, Dp) f32, broadcasts over batch
    inv_mask = 1.0 - mask

    # Fused first layer of both MLPs.  The mask is already folded into W1's
    # rows at pack time, so no (TB, Dp) VPU multiply is needed here.
    h = jnp.tanh(
        jnp.dot(x_in.astype(w1_ref.dtype), w1_ref[...],
                preferred_element_type=jnp.float32)
        + b1_ref[...]
    )

    # Fused (block-diagonal) second layer -> (TB, 2*Dp) = [s | t].
    # TODO(synk): on v5e, if this matmul ever becomes the binding unit (large
    # H/D, MXU-bound), split it back into two (Hp,Dp) dots: the block-diagonal
    # fusion does 2x the necessary MACs and v5e's 4x128^2 MXU maps two small
    # dots natively.  On v6e/v7x the fused 256-wide push fills the MXU, keep it.
    st = (
        jnp.dot(h.astype(w2_ref.dtype), w2_ref[...],
                preferred_element_type=jnp.float32)
        + b2_ref[...]
    )

    dp = x.shape[1]                          # padded feature dim (multiple of 128)
    s = st[:, :dp]                           # lane-tile-aligned slices (cheap)
    t = st[:, dp:]

    # Affine coupling transform (f32 elementwise tail on all chips).
    x_masked = x * mask
    z = x_masked + inv_mask * (x * jnp.exp(s) + t)
    z_ref[...] = z.astype(z_ref.dtype)

    # Log-det of the Jacobian, broadcast across lanes -> lane-dense store.
    ld = jnp.sum(s * inv_mask, axis=1, keepdims=True)           # (TB, 1)
    ld_ref[...] = jnp.broadcast_to(ld, ld_ref.shape)             # (TB, 128)


def pack_coupling_params(mask, params, *, weight_dtype=jnp.float32):
    """One-time packing of the fused / lane-padded coupling parameters.

    Call this ONCE at parameter-init time (not inside the forward) -- the
    zero-pad + scatter work and XLA dispatch would otherwise re-run on every
    forward call and dwarf the kernel at small batch sizes.

    mask: (D,) 0/1 floats.  params: dict with w1s (D,H), b1s (1,H) or (H,),
    w2s (H,D), b2s (1,D) or (D,), and the *t counterparts.
    """
    D = int(mask.shape[0])
    H = int(params["w1s"].shape[1])
    Dp = _round_up(max(D, LANE), LANE)       # lane-dense feature dim
    Hp = _round_up(max(H, LANE), LANE)       # lane-dense hidden dim

    mask_f = mask.astype(jnp.float32).reshape(D)

    # Fold the mask into W1's rows: x @ (diag(mask) @ W1) == (x*mask) @ W1
    # exactly (mask is 0/1), saving a per-step VPU multiply in the kernel.
    w1s_m = params["w1s"].astype(jnp.float32) * mask_f[:, None]
    w1t_m = params["w1t"].astype(jnp.float32) * mask_f[:, None]

    w1 = jnp.zeros((Dp, 2 * Hp), jnp.float32)
    w1 = w1.at[:D, :H].set(w1s_m)
    w1 = w1.at[:D, Hp:Hp + H].set(w1t_m)

    b1 = jnp.zeros((1, 2 * Hp), jnp.float32)
    b1 = b1.at[0, :H].set(params["b1s"].reshape(-1).astype(jnp.float32))
    b1 = b1.at[0, Hp:Hp + H].set(params["b1t"].reshape(-1).astype(jnp.float32))

    w2 = jnp.zeros((2 * Hp, 2 * Dp), jnp.float32)
    w2 = w2.at[:H, :D].set(params["w2s"].astype(jnp.float32))
    w2 = w2.at[Hp:Hp + H, Dp:Dp + D].set(params["w2t"].astype(jnp.float32))

    b2 = jnp.zeros((1, 2 * Dp), jnp.float32)
    b2 = b2.at[0, :D].set(params["b2s"].reshape(-1).astype(jnp.float32))
    b2 = b2.at[0, Dp:Dp + D].set(params["b2t"].reshape(-1).astype(jnp.float32))

    # Mask is padded with ONES so padded feature lanes are pure pass-through:
    # with zero-padded x and zero weight pad blocks, padded lanes give z = 0
    # and contribute exactly 0 to log_det.  Keep this invariant if the W1
    # packing changes.
    mask_p = jnp.ones((1, Dp), jnp.float32).at[0, :D].set(mask_f)

    # Only matmul operands may be narrowed; biases stay f32 (added to f32 acc).
    return {
        "w1": w1.astype(weight_dtype), "b1": b1,
        "w2": w2.astype(weight_dtype), "b2": b2,
        "mask": mask_p,
    }


@functools.partial(jax.jit, static_argnames=("tile_b", "io_dtype"))
def masked_affine_coupling_forward(x, packed, *, tile_b=512,
                                   io_dtype=jnp.float32):
    """Forward pass of MaskedAffineCoupling.

    x: (B, D) float.  packed: output of pack_coupling_params().
    Returns z (B, D) in io_dtype and log_det (B,) f32.

    tile_b: batch tile (multiple of 8; automatically clamped to the batch).
      Large tiles are the single biggest lever for big B: 8-row tiles under-fill
      the MXU and are swamped by the ~0.35 us per-grid-step overhead, while
      256-512 row tiles approach the HBM roofline.  VMEM upper bound per step
      (double-buffered):
        2*tile_b*Dp*io_bytes (x) + 2*tile_b*Dp*io_bytes (z)
        + 2*tile_b*128*4 (log_det) + 2*((Dp*2Hp + 2Hp*2Dp)*w_bytes)
        + ~tile_b*(2Hp+2Dp)*8 of temporaries
      which must stay within the scoped VMEM limit (default 32 MiB here; the
      physical ceiling is 128 MiB on v5e/v6e and 64 MiB/TensorCore on v7x).
      For huge D/H, cap tile_b on v7x accordingly.  For large B keep
      Bp/tile_b >= 2 (ideally >= 4) so v7x's two TensorCores can each take grid
      steps and the input/output pipeline has something to overlap.

    io_dtype: dtype of the streamed x input / z output (the dominant HBM
      traffic at large B).  jnp.bfloat16 halves that traffic on v6e/v7x; the
      elementwise tail always runs in f32, so it is also safe on v5e.

    TODO(synk): on v7x with very large D/H, single-buffer the resident weight
      BlockSpecs (pipeline_mode=pl.Buffered(1)) to halve their VMEM footprint
      and free room for a larger tile_b.
    TODO(synk): for a full RealNVP stack of many coupling layers at tiny D/H,
      fuse several layers into one pallas_call (weights resident, loop layers
      in-kernel) to amortize launch/DMA overhead.
    """
    B, D = x.shape
    Dp = packed["mask"].shape[1]
    Hp = packed["w1"].shape[1] // 2

    # Clamp the batch tile to the (sublane-rounded) batch and keep it a
    # multiple of 8.
    tb = min(int(tile_b), _round_up(B, SUBLANE))
    tb = max(SUBLANE, (tb // SUBLANE) * SUBLANE)
    Bp = _round_up(B, tb)

    # Skip the pad (an extra HBM pass over the activations) when the shapes
    # are already aligned; pad x with zeros otherwise.
    padded = (D != Dp) or (B != Bp)
    if padded:
        x_in = jnp.zeros((Bp, Dp), io_dtype).at[:B, :D].set(x.astype(io_dtype))
    else:
        x_in = x.astype(io_dtype)

    grid = (Bp // tb,)

    z_p, ld_p = pl.pallas_call(
        _coupling_kernel,
        out_shape=(
            jax.ShapeDtypeStruct((Bp, Dp), io_dtype),
            jax.ShapeDtypeStruct((Bp, LANE), jnp.float32),   # lane-dense log_det slab
        ),
        grid_spec=pltpu.PrefetchScalarGridSpec(
            num_scalar_prefetch=0,
            grid=grid,
            in_specs=[
                pl.BlockSpec((tb, Dp), lambda i: (i, 0)),            # x stream
                pl.BlockSpec((1, Dp), lambda i: (0, 0)),             # mask (resident)
                pl.BlockSpec((Dp, 2 * Hp), lambda i: (0, 0)),        # fused W1 (resident)
                pl.BlockSpec((1, 2 * Hp), lambda i: (0, 0)),         # fused b1
                pl.BlockSpec((2 * Hp, 2 * Dp), lambda i: (0, 0)),    # fused W2 (resident)
                pl.BlockSpec((1, 2 * Dp), lambda i: (0, 0)),         # fused b2
            ],
            out_specs=[
                pl.BlockSpec((tb, Dp), lambda i: (i, 0)),            # z stream
                pl.BlockSpec((tb, LANE), lambda i: (i, 0)),          # log_det slab
            ],
        ),
        compiler_params=pltpu.CompilerParams(
            # Batch axis is embarrassingly parallel -> shard across v7x's 2 TCs.
            dimension_semantics=("parallel",),
            # 32 MiB is within every generation's scoped budget (v5e default is
            # only 16 MiB) and far above this kernel's per-step footprint at
            # these shapes; raise it for very large D/H/tile_b.
            vmem_limit_bytes=32 * 1024 * 1024,
        ),
    )(x_in, packed["mask"], packed["w1"], packed["b1"],
      packed["w2"], packed["b2"])

    z = z_p[:B, :D] if padded else z_p
    log_det = ld_p[:B, 0]
    return z, log_det


def _reference_forward(x, mask, params):
    """Pure-JAX reference mirroring the PyTorch module semantics."""
    x_masked = x * mask
    h_s = jnp.tanh(x_masked @ params["w1s"] + params["b1s"])
    s = h_s @ params["w2s"] + params["b2s"]
    h_t = jnp.tanh(x_masked @ params["w1t"] + params["b1t"])
    t = h_t @ params["w2t"] + params["b2t"]
    z = x_masked + (1.0 - mask) * (x * jnp.exp(s) + t)
    log_det = jnp.sum(s * (1.0 - mask), axis=1)
    return z, log_det


if __name__ == "__main__":
    B, D, H = 16, 16, 32   # small demo shapes

    key = jax.random.PRNGKey(0)
    kx, k1, k2, k3, k4 = jax.random.split(key, 5)

    x = jax.random.normal(kx, (B, D), dtype=jnp.float32)

    # Alternating binary mask (typical RealNVP checkerboard over features).
    mask = (jnp.arange(D) % 2).astype(jnp.float32)   # (D,)

    # Deterministic synthetic 2-layer MLP parameters (tanh hidden).
    scale = 0.1
    params = {
        "w1s": scale * jax.random.normal(k1, (D, H), dtype=jnp.float32),
        "b1s": jnp.zeros((1, H), dtype=jnp.float32),
        "w2s": scale * jax.random.normal(k2, (H, D), dtype=jnp.float32),
        "b2s": jnp.zeros((1, D), dtype=jnp.float32),
        "w1t": scale * jax.random.normal(k3, (D, H), dtype=jnp.float32),
        "b1t": jnp.zeros((1, H), dtype=jnp.float32),
        "w2t": scale * jax.random.normal(k4, (H, D), dtype=jnp.float32),
        "b2t": jnp.zeros((1, D), dtype=jnp.float32),
    }

    # Pack / pad / fuse the parameters ONCE (init time, outside the hot path).
    packed = pack_coupling_params(mask, params)

    z_ref, ld_ref = _reference_forward(x, mask.reshape(1, D), params)

    # Default tile_b (clamped to the tiny demo batch); f32 I/O -> tight match.
    z, log_det = masked_affine_coupling_forward(x, packed)
    jax.block_until_ready((z, log_det))
    assert jnp.allclose(z, z_ref, atol=1e-5, rtol=1e-5)
    assert jnp.allclose(log_det, ld_ref, atol=1e-5, rtol=1e-5)

    # Multi-step grid (tile_b=8 -> 2 batch tiles) to exercise the pipeline.
    z2, ld2 = masked_affine_coupling_forward(x, packed, tile_b=8)
    jax.block_until_ready((z2, ld2))
    assert jnp.allclose(z2, z_ref, atol=1e-5, rtol=1e-5)
    assert jnp.allclose(ld2, ld_ref, atol=1e-5, rtol=1e-5)

    # bf16 activation-stream path (halves dominant HBM traffic on v6e/v7x);
    # the elementwise tail and log_det stay f32.
    z_bf, ld_bf = masked_affine_coupling_forward(x, packed,
                                                 io_dtype=jnp.bfloat16)
    jax.block_until_ready((z_bf, ld_bf))
    assert jnp.allclose(z_bf.astype(jnp.float32), z_ref, atol=1e-1, rtol=1e-1)
    assert jnp.allclose(ld_bf, ld_ref, atol=1e-1, rtol=1e-1)

    print("KERNEL_OK")
</pallas_src>

<mosaic_0001>
module attributes {stable_mosaic.version = 11 : i64} {
  func.func @_coupling_kernel(%arg0: i32, %arg1: memref<16x128xf32, #tpu.memory_space<vmem>>, %arg2: memref<1x128xf32, #tpu.memory_space<vmem>>, %arg3: memref<128x256xf32, #tpu.memory_space<vmem>>, %arg4: memref<1x256xf32, #tpu.memory_space<vmem>>, %arg5: memref<256x256xf32, #tpu.memory_space<vmem>>, %arg6: memref<1x256xf32, #tpu.memory_space<vmem>>, %arg7: memref<16x128xf32, #tpu.memory_space<vmem>>, %arg8: memref<16x128xf32, #tpu.memory_space<vmem>>) attributes {dimension_semantics = [#tpu.dimension_semantics<parallel>], iteration_bounds = array<i64: 1>, scalar_prefetch = 0 : i64, scratch_operands = 0 : i64, tpu.core_type = #tpu.core_type<tc>, window_params = [{transform_indices = @transform_0, window_bounds = array<i64: 16, 128>}, {pipeline_mode = #tpu.pipeline_mode<synchronous>, transform_indices = @transform_1, window_bounds = array<i64: 1, 128>}, {pipeline_mode = #tpu.pipeline_mode<synchronous>, transform_indices = @transform_2, window_bounds = array<i64: 128, 256>}, {pipeline_mode = #tpu.pipeline_mode<synchronous>, transform_indices = @transform_3, window_bounds = array<i64: 1, 256>}, {pipeline_mode = #tpu.pipeline_mode<synchronous>, transform_indices = @transform_4, window_bounds = array<i64: 256, 256>}, {pipeline_mode = #tpu.pipeline_mode<synchronous>, transform_indices = @transform_5, window_bounds = array<i64: 1, 256>}, {transform_indices = @transform_6, window_bounds = array<i64: 16, 128>}, {transform_indices = @transform_7, window_bounds = array<i64: 16, 128>}]} {
    %c0 = arith.constant 0 : index
    %c0_0 = arith.constant 0 : index
    %0 = vector.load %arg1[%c0, %c0_0] : memref<16x128xf32, #tpu.memory_space<vmem>>, vector<16x128xf32>
    %c0_1 = arith.constant 0 : index
    %c0_2 = arith.constant 0 : index
    %1 = vector.load %arg2[%c0_1, %c0_2] : memref<1x128xf32, #tpu.memory_space<vmem>>, vector<1x128xf32>
    %cst = arith.constant 1.000000e+00 : f32
    %2 = vector.broadcast %cst : f32 to vector<1x128xf32>
    %3 = arith.subf %2, %1 : vector<1x128xf32>
    %c0_3 = arith.constant 0 : index
    %c0_4 = arith.constant 0 : index
    %4 = vector.load %arg3[%c0_3, %c0_4] : memref<128x256xf32, #tpu.memory_space<vmem>>, vector<128x256xf32>
    %cst_5 = arith.constant dense<0.000000e+00> : vector<16x256xf32>
    %5 = tpu.matmul %0, %4, %cst_5 {dimension_numbers = #tpu.dot_dimension_numbers<[1], [0], [0], [1], [0, 0, 1, 1], [], []>} : vector<16x128xf32>, vector<128x256xf32>, vector<16x256xf32> -> vector<16x256xf32>
    %c0_6 = arith.constant 0 : index
    %c0_7 = arith.constant 0 : index
    %6 = vector.load %arg4[%c0_6, %c0_7] : memref<1x256xf32, #tpu.memory_space<vmem>>, vector<1x256xf32>
    %7 = vector.broadcast %6 : vector<1x256xf32> to vector<16x256xf32>
    %8 = arith.addf %5, %7 : vector<16x256xf32>
    %9 = math.tanh %8 : vector<16x256xf32>
    %c0_8 = arith.constant 0 : index
    %c0_9 = arith.constant 0 : index
    %10 = vector.load %arg5[%c0_8, %c0_9] : memref<256x256xf32, #tpu.memory_space<vmem>>, vector<256x256xf32>
    %cst_10 = arith.constant dense<0.000000e+00> : vector<16x256xf32>
    %11 = tpu.matmul %9, %10, %cst_10 {dimension_numbers = #tpu.dot_dimension_numbers<[1], [0], [0], [1], [0, 0, 1, 1], [], []>} : vector<16x256xf32>, vector<256x256xf32>, vector<16x256xf32> -> vector<16x256xf32>
    %c0_11 = arith.constant 0 : index
    %c0_12 = arith.constant 0 : index
    %12 = vector.load %arg6[%c0_11, %c0_12] : memref<1x256xf32, #tpu.memory_space<vmem>>, vector<1x256xf32>
    %13 = vector.broadcast %12 : vector<1x256xf32> to vector<16x256xf32>
    %14 = arith.addf %11, %13 : vector<16x256xf32>
    %15 = vector.extract_strided_slice %14 {offsets = [0, 0], sizes = [16, 128], strides = [1, 1]} : vector<16x256xf32> to vector<16x128xf32>
    %16 = vector.extract_strided_slice %14 {offsets = [0, 128], sizes = [16, 128], strides = [1, 1]} : vector<16x256xf32> to vector<16x128xf32>
    %17 = vector.broadcast %1 : vector<1x128xf32> to vector<16x128xf32>
    %18 = arith.mulf %0, %17 : vector<16x128xf32>
    %19 = math.exp %15 : vector<16x128xf32>
    %20 = arith.mulf %0, %19 : vector<16x128xf32>
    %21 = arith.addf %20, %16 : vector<16x128xf32>
    %22 = vector.broadcast %3 : vector<1x128xf32> to vector<16x128xf32>
    %23 = arith.mulf %22, %21 : vector<16x128xf32>
    %24 = arith.addf %18, %23 : vector<16x128xf32>
    %c0_13 = arith.constant 0 : index
    %c0_14 = arith.constant 0 : index
    %25 = vector.load %arg7[%c0_13, %c0_14] : memref<16x128xf32, #tpu.memory_space<vmem>>, vector<16x128xf32>
    tpu.vector_store %arg7[%c0_13, %c0_14], %24 {strides = array<i32>} : memref<16x128xf32, #tpu.memory_space<vmem>>, vector<16x128xf32>,
    %26 = vector.broadcast %3 : vector<1x128xf32> to vector<16x128xf32>
    %27 = arith.mulf %15, %26 : vector<16x128xf32>
    %cst_15 = arith.constant dense<0.000000e+00> : vector<16xf32>
    %28 = vector.multi_reduction <add>, %27, %cst_15 [1] : vector<16x128xf32> to vector<16xf32>
    %29 = vector.shape_cast %28 : vector<16xf32> to vector<16x1xf32>
    %30 = vector.shape_cast %29 : vector<16x1xf32> to vector<16x1xf32>
    %31 = vector.broadcast %30 : vector<16x1xf32> to vector<16x128xf32>
    %c0_16 = arith.constant 0 : index
    %c0_17 = arith.constant 0 : index
    %32 = vector.load %arg8[%c0_16, %c0_17] : memref<16x128xf32, #tpu.memory_space<vmem>>, vector<16x128xf32>
    tpu.vector_store %arg8[%c0_16, %c0_17], %31 {strides = array<i32>} : memref<16x128xf32, #tpu.memory_space<vmem>>, vector<16x128xf32>,
    return
  }
  func.func @transform_0(%arg0: i32) -> (i32, i32) {
    %c0_i32 = arith.constant 0 : i32
    %c0_i32_0 = arith.constant 0 : i32
    return %arg0, %c0_i32 : i32, i32
  }
  func.func @transform_1(%arg0: i32) -> (i32, i32) {
    %c0_i32 = arith.constant 0 : i32
    %c0_i32_0 = arith.constant 0 : i32
    %c0_i32_1 = arith.constant 0 : i32
    return %c0_i32, %c0_i32_0 : i32, i32
  }
  func.func @transform_2(%arg0: i32) -> (i32, i32) {
    %c0_i32 = arith.constant 0 : i32
    %c0_i32_0 = arith.constant 0 : i32
    %c0_i32_1 = arith.constant 0 : i32
    return %c0_i32, %c0_i32_0 : i32, i32
  }
  func.func @transform_3(%arg0: i32) -> (i32, i32) {
    %c0_i32 = arith.constant 0 : i32
    %c0_i32_0 = arith.constant 0 : i32
    %c0_i32_1 = arith.constant 0 : i32
    return %c0_i32, %c0_i32_0 : i32, i32
  }
  func.func @transform_4(%arg0: i32) -> (i32, i32) {
    %c0_i32 = arith.constant 0 : i32
    %c0_i32_0 = arith.constant 0 : i32
    %c0_i32_1 = arith.constant 0 : i32
    return %c0_i32, %c0_i32_0 : i32, i32
  }
  func.func @transform_5(%arg0: i32) -> (i32, i32) {
    %c0_i32 = arith.constant 0 : i32
    %c0_i32_0 = arith.constant 0 : i32
    %c0_i32_1 = arith.constant 0 : i32
    return %c0_i32, %c0_i32_0 : i32, i32
  }
  func.func @transform_6(%arg0: i32) -> (i32, i32) {
    %c0_i32 = arith.constant 0 : i32
    %c0_i32_0 = arith.constant 0 : i32
    return %arg0, %c0_i32 : i32, i32
  }
  func.func @transform_7(%arg0: i32) -> (i32, i32) {
    %c0_i32 = arith.constant 0 : i32
    %c0_i32_0 = arith.constant 0 : i32
    return %arg0, %c0_i32 : i32, i32
  }
}

</mosaic_0001>

<bundles_post_ra>
// kernel: masked_affine_coupling_forward.1
= control target key start
LH: loop header
LB: loop body
LE: loop exit
PB: predicated region body
PF: predicated region fallthrough
CT: control target
= control target key end

     0   :  { %13 = vsyncpa [#allocation3], 0  ;;  %s699_s0 = inlined_call_operand.vmem [shape: f32[16,128], index: 0, kind: input, shape index: {}]   ;;  %s700_s1 = inlined_call_operand.vmem [shape: f32[1,128], index: 1, kind: input, shape index: {}]   ;;  %s701_s2 = inlined_call_operand.hbm [shape: f32[128,256], index: 2, kind: input, shape index: {}]   ;;  %s702_s3 = inlined_call_operand.vmem [shape: f32[1,256], index: 3, kind: input, shape index: {}]   ;;  %s703_s4 = inlined_call_operand.hbm [shape: f32[256,256], index: 4, kind: input, shape index: {}]   ;;  %s704_s5 = inlined_call_operand.vmem [shape: f32[1,256], index: 5, kind: input, shape index: {}]   ;;  %s705_s6 = inlined_call_operand.hbm [shape: f32[16,128], index: 6, kind: output, shape index: {0}]   ;;  %s706_s7 = inlined_call_operand.vmem [shape: f32[16,128], index: 7, kind: output, shape index: {1}]  }
   0x1   :  { %14 = vsyncpa [#allocation6], 0 }
   0x2   :  { %15 = vsyncpa [#allocation4], 0  ;;  %s582_s24 = smov [#allocation2]   ;;  %s510_s28 = scalar_lea.hbm %s701_s2, 4096 }
   0x3   :  { %s25_s25 = sshll.u32 %s582_s24, 4  ;;  %p511_p0 = scmp.ne.s32.totalorder %s701_s2, %s510_s28  ;;  %s26_s25 = int_to_ptr.vmem [resolvable:$true] %s25_s25 }
   0x4   :  { %p514_p1 = scmp.lt.u32.totalorder %s510_s28, %s701_s2 }
   0x6   :  { %p516_p2 = pnand %p514_p1, %p511_p0 }
   0x8   :  { %519 = shalt.err (!%p516_p2)
}
   0x9   :  { %s520_s10 = scalar_lea.vmem %s26_s25, 4096  ;;  %p525_p4 = scmp.lt.s32.totalorder %s26_s25, %s26_s25 }
   0xa   :  { %p521_p3 = scmp.ne.s32.totalorder %s26_s25, %s520_s10  ;;  %p526_p5 = scmp.lt.s32.totalorder %s520_s10, %s520_s10 }
   0xc   :  { %p527_p6 = por %p526_p5, %p525_p4 }
   0xe   :  { %p528_p7 = pnand %p527_p6, %p521_p3 }
  0x10   :  { %531 = shalt.err (!%p528_p7)
}
  0x11   :  { %s583_s11 = smov 256   ;;  %s584_s12 = smov 16  }
  0x12   :  { %31 = dma.hbm_to_vmem [thread:$0]  %s701_s2, 4096, %s26_s25, [#allocation3], %s583_s11, %s583_s11, %s584_s12  }
  0x13   :  { %s585_s15 = smov [#allocation5]   ;;  %s532_s19 = scalar_lea.hbm %s703_s4, 8192 }
  0x14   :  { %s39_s16 = sshll.u32 %s585_s15, 4  ;;  %p533_p8 = scmp.ne.s32.totalorder %s703_s4, %s532_s19  ;;  %s40_s16 = int_to_ptr.vmem [resolvable:$true] %s39_s16 }
  0x15   :  { %p536_p9 = scmp.lt.u32.totalorder %s532_s19, %s703_s4 }
  0x17   :  { %p538_p10 = pnand %p536_p9, %p533_p8 }
  0x19   :  { %541 = shalt.err (!%p538_p10)
}
  0x1a   :  { %s542_s24 = scalar_lea.vmem %s40_s16, 8192  ;;  %p547_p12 = scmp.lt.s32.totalorder %s40_s16, %s40_s16 }
  0x1b   :  { %p543_p11 = scmp.ne.s32.totalorder %s40_s16, %s542_s24  ;;  %p548_p13 = scmp.lt.s32.totalorder %s542_s24, %s542_s24 }
  0x1d   :  { %p549_p0 = por %p548_p13, %p547_p12 }
  0x1f   :  { %p550_p1 = pnand %p549_p0, %p543_p11 }
  0x21   :  { %553 = shalt.err (!%p550_p1)
}
  0x22   :  { %45 = dma.hbm_to_vmem [thread:$0]  %s703_s4, 8192, %s40_s16, [#allocation6], %s583_s11, %s583_s11, %s584_s12  }
  0x23   :  { %576 = dma.done.wait [#allocation3], 4096  }
  0x24   :  { %577 = vsyncadd [#allocation3], 4294963200 }
  0x25   :  { %578 = dma.done.wait [#allocation6], 8192  }
  0x26   :  { %579 = vsyncadd [#allocation6], 4294959104  ;;  %v586_v0 = vmov 0.0   ;;  %v59_v1 = vld [vmem:[#allocation2 + $0x8] sm:$0xff]  ;;  %v61_v2 = vld [vmem:[#allocation2 + $0x18] sm:$0xff] }
  0x27   :  { %166 = vmatprep.mubr.f32.mxu0 %v586_v0  ;;  %v58_v3 = vld [vmem:[#allocation2] sm:$0xff]  ;;  %v394_v4 = vpack.c.bf16 %v61_v2, %v59_v1  ;;  %v60_v5 = vld [vmem:[#allocation2 + $0x10] sm:$0xff]  ;;  %v63_v6 = vld [vmem:[#allocation2 + $0x28] sm:$0xff] }
  0x28   :  { %v65_v7 = vld [vmem:[#allocation2 + $0x38] sm:$0xff]  ;;  %v396_v8 = vpack.c.bf16 %v60_v5, %v58_v3  ;;  %v62_v10 = vld [vmem:[#allocation2 + $0x20] sm:$0xff]  ;;  %v64_v11 = vld [vmem:[#allocation2 + $0x30] sm:$0xff] }
  0x29   :  { %v398_v9 = vpack.c.bf16 %v65_v7, %v63_v6  ;;  %v67_v12 = vld [vmem:[#allocation2 + $0x48] sm:$0xff]  ;;  %395 = vmatprep.subr.bf16.mxu0 %v394_v4  ;;  %v69_v13 = vld [vmem:[#allocation2 + $0x58] sm:$0xff]  ;;  %v400_v14 = vpack.c.bf16 %v64_v11, %v62_v10  ;;  %v66_v16 = vld [vmem:[#allocation2 + $0x40] sm:$0xff] }
  0x2a   :  { %397 = vmatpush1.bf16.msra.mxu0 %v396_v8  ;;  %v402_v15 = vpack.c.bf16 %v69_v13, %v67_v12  ;;  %v68_v17 = vld [vmem:[#allocation2 + $0x50] sm:$0xff]  ;;  %v71_v18 = vld [vmem:[#allocation2 + $0x68] sm:$0xff]  ;;  %v73_v19 = vld [vmem:[#allocation2 + $0x78] sm:$0xff] }
  0x2b   :  { %399 = vmatprep.subr.bf16.mxu0 %v398_v9  ;;  %v404_v20 = vpack.c.bf16 %v68_v17, %v66_v16  ;;  %v406_v21 = vpack.c.bf16 %v73_v19, %v71_v18  ;;  %v70_v22 = vld [vmem:[#allocation2 + $0x60] sm:$0xff]  ;;  %v72_v23 = vld [vmem:[#allocation2 + $0x70] sm:$0xff]  ;;  %v75_v24 = vld [vmem:[#allocation2 + $0x88] sm:$0xff] }
  0x2c   :  { %v77_v25 = vld [vmem:[#allocation2 + $0x98] sm:$0xff]  ;;  %v74_v26 = vld [vmem:[#allocation2 + $0x80] sm:$0xff]  ;;  %v76_v27 = vld [vmem:[#allocation2 + $0x90] sm:$0xff]  ;;  %v408_v29 = vpack.c.bf16 %v72_v23, %v70_v22 }
  0x2d   :  { %v184_v28 = vld [vmem:[#allocation5 + $0x8] sm:$0xff]  ;;  %v81_v31 = vld [vmem:[#allocation2 + $0xb8] sm:$0xff]  ;;  %v183_v33 = vld [vmem:[#allocation5] sm:$0xff]  ;;  %v410_v35 = vpack.c.bf16 %v77_v25, %v75_v24  ;;  %v412_v45 = vpack.c.bf16 %v76_v27, %v74_v26 }
  0x2e   :  { %401 = vmatpush1.bf16.msra.mxu0 %v400_v14  ;;  %v79_v30 = vld [vmem:[#allocation2 + $0xa8] sm:$0xff]  ;;  %v186_v32 = vld [vmem:[#allocation5 + $0x18] sm:$0xff]  ;;  %v185_v34 = vld [vmem:[#allocation5 + $0x10] sm:$0xff] }
  0x2f   :  { %403 = vmatprep.subr.bf16.mxu0 %v402_v15  ;;  %v426_v36 = vpack.c.bf16 %v186_v32, %v184_v28  ;;  %v428_v37 = vpack.c.bf16 %v185_v34, %v183_v33  ;;  %v188_v38 = vld [vmem:[#allocation5 + $0x28] sm:$0xff]  ;;  %v190_v39 = vld [vmem:[#allocation5 + $0x38] sm:$0xff]  ;;  %v187_v40 = vld [vmem:[#allocation5 + $0x20] sm:$0xff]  ;;  %v414_v49 = vpack.c.bf16 %v81_v31, %v79_v30 }
  0x30   :  { %v430_v41 = vpack.c.bf16 %v190_v39, %v188_v38  ;;  %v189_v42 = vld [vmem:[#allocation5 + $0x30] sm:$0xff]  ;;  %v192_v43 = vld [vmem:[#allocation5 + $0x48] sm:$0xff]  ;;  %v194_v44 = vld [vmem:[#allocation5 + $0x58] sm:$0xff] }
  0x31   :  { %427 = vmatprep.subr.bf16.mxu1 %v426_v36  ;;  %v78_v46 = vld [vmem:[#allocation2 + $0xa0] sm:$0xff]  ;;  %v80_v47 = vld [vmem:[#allocation2 + $0xb0] sm:$0xff]  ;;  %v432_v48 = vpack.c.bf16 %v189_v42, %v187_v40  ;;  %v83_v50 = vld [vmem:[#allocation2 + $0xc8] sm:$0xff]  ;;  %v434_v51 = vpack.c.bf16 %v194_v44, %v192_v43 }
  0x32   :  { %405 = vmatpush1.bf16.msra.mxu0 %v404_v20  ;;  %429 = vmatpush1.bf16.msra.mxu1 %v428_v37  ;;  %v191_v52 = vld [vmem:[#allocation5 + $0x40] sm:$0xff]  ;;  %v193_v53 = vld [vmem:[#allocation5 + $0x50] sm:$0xff]  ;;  %v85_v54 = vld [vmem:[#allocation2 + $0xd8] sm:$0xff]  ;;  %v416_v57 = vpack.c.bf16 %v80_v47, %v78_v46 }
  0x33   :  { %407 = vmatprep.subr.bf16.mxu0 %v406_v21  ;;  %431 = vmatprep.subr.bf16.mxu1 %v430_v41  ;;  %v196_v55 = vld [vmem:[#allocation5 + $0x68] sm:$0xff]  ;;  %v198_v56 = vld [vmem:[#allocation5 + $0x78] sm:$0xff]  ;;  %v82_v58 = vld [vmem:[#allocation2 + $0xc0] sm:$0xff]  ;;  %v436_v60 = vpack.c.bf16 %v193_v53, %v191_v52  ;;  %v418_v61 = vpack.c.bf16 %v85_v54, %v83_v50 }
  0x34   :  { %v84_v59 = vld [vmem:[#allocation2 + $0xd0] sm:$0xff]  ;;  %v87_v62 = vld [vmem:[#allocation2 + $0xe8] sm:$0xff]  ;;  %v438_v63 = vpack.c.bf16 %v198_v56, %v196_v55  ;;  %v195_v1 = vld [vmem:[#allocation5 + $0x60] sm:$0xff] }
  0x35   :  { %v197_v2 = vld [vmem:[#allocation5 + $0x70] sm:$0xff]  ;;  %v89_v3 = vld [vmem:[#allocation2 + $0xf8] sm:$0xff]  ;;  %v200_v4 = vld [vmem:[#allocation5 + $0x88] sm:$0xff]  ;;  %v420_v6 = vpack.c.bf16 %v84_v59, %v82_v58 }
  0x36   :  { %409 = vmatpush1.bf16.msra.mxu0 %v408_v29  ;;  %433 = vmatpush1.bf16.msra.mxu1 %v432_v48  ;;  %v202_v5 = vld [vmem:[#allocation5 + $0x98] sm:$0xff]  ;;  %v86_v7 = vld [vmem:[#allocation2 + $0xe0] sm:$0xff]  ;;  %v440_v8 = vpack.c.bf16 %v197_v2, %v195_v1  ;;  %v422_v9 = vpack.c.bf16 %v89_v3, %v87_v62  ;;  %v88_v10 = vld [vmem:[#allocation2 + $0xf0] sm:$0xff] }
  0x37   :  { %411 = vmatprep.subr.bf16.mxu0 %v410_v35  ;;  %435 = vmatprep.subr.bf16.mxu1 %v434_v51  ;;  %v442_v11 = vpack.c.bf16 %v202_v5, %v200_v4  ;;  %v199_v12 = vld [vmem:[#allocation5 + $0x80] sm:$0xff]  ;;  %v201_v13 = vld [vmem:[#allocation5 + $0x90] sm:$0xff]  ;;  %v204_v14 = vld [vmem:[#allocation5 + $0xa8] sm:$0xff]  ;;  %v424_v16 = vpack.c.bf16 %v88_v10, %v86_v7 }
  0x38   :  { %v206_v15 = vld [vmem:[#allocation5 + $0xb8] sm:$0xff]  ;;  %v444_v17 = vpack.c.bf16 %v201_v13, %v199_v12  ;;  %v203_v19 = vld [vmem:[#allocation5 + $0xa0] sm:$0xff]  ;;  %v205_v20 = vld [vmem:[#allocation5 + $0xb0] sm:$0xff] }
  0x39   :  { %v446_v18 = vpack.c.bf16 %v206_v15, %v204_v14  ;;  %v208_v21 = vld [vmem:[#allocation5 + $0xc8] sm:$0xff]  ;;  %v210_v22 = vld [vmem:[#allocation5 + $0xd8] sm:$0xff]  ;;  %v658_v23 = vld [vmem:[%s699_s0] sm:$0xff]  ;;  %v448_v24 = vpack.c.bf16 %v205_v20, %v203_v19  ;;  %v92_v20 = vlaneseq }
  0x3a   :  { %413 = vmatpush1.bf16.msra.mxu0 %v412_v45  ;;  %437 = vmatpush1.bf16.msra.mxu1 %v436_v60  ;;  %v450_v25 = vpack.c.bf16 %v210_v22, %v208_v21  ;;  %v207_v26 = vld [vmem:[#allocation5 + $0xc0] sm:$0xff]  ;;  %v209_v27 = vld [vmem:[#allocation5 + $0xd0] sm:$0xff]  ;;  %v212_v28 = vld [vmem:[#allocation5 + $0xe8] sm:$0xff] }
  0x3b   :  { %415 = vmatprep.subr.bf16.mxu0 %v414_v49  ;;  %439 = vmatprep.subr.bf16.mxu1 %v438_v63  ;;  %v214_v29 = vld [vmem:[#allocation5 + $0xf8] sm:$0xff]  ;;  %v665_v30 = vld [vmem:[%s699_s0 + $0x8] sm:$0xff]  ;;  %v452_v31 = vpack.c.bf16 %v209_v27, %v207_v26  ;;  %v211_v33 = vld [vmem:[#allocation5 + $0xe0] sm:$0xff]  ;;  %v93_v21 = vshrl.u32 %v92_v20, 7 }
  0x3c   :  { %v454_v32 = vpack.c.bf16 %v214_v29, %v212_v28  ;;  %v213_v34 = vld [vmem:[#allocation5 + $0xf0] sm:$0xff]  ;;  %v216_v35 = vld [vmem:[#allocation5 + $0x108] sm:$0xff]  ;;  %v218_v36 = vld [vmem:[#allocation5 + $0x118] sm:$0xff] }
  0x3d   :  { %v456_v37 = vpack.c.bf16 %v213_v34, %v211_v33  ;;  %v458_v38 = vpack.c.bf16 %v218_v36, %v216_v35  ;;  %v217_v39 = vld [vmem:[#allocation5 + $0x110] sm:$0xff]  ;;  %v220_v40 = vld [vmem:[#allocation5 + $0x128] sm:$0xff]  ;;  %v222_v41 = vld [vmem:[#allocation5 + $0x138] sm:$0xff]  ;;  %v94_v22 = vsub.s32 0, %v93_v21 }
  0x3e   :  { %417 = vmatpush1.bf16.msra.mxu0 %v416_v57  ;;  %441 = vmatpush1.bf16.msra.mxu1 %v440_v8  ;;  %v462_v43 = vpack.c.bf16 %v222_v41, %v220_v40  ;;  %v219_v44 = vld [vmem:[#allocation5 + $0x120] sm:$0xff]  ;;  %v221_v45 = vld [vmem:[#allocation5 + $0x130] sm:$0xff]  ;;  %v224_v46 = vld [vmem:[#allocation5 + $0x148] sm:$0xff] }
  0x3f   :  { %419 = vmatprep.subr.bf16.mxu0 %v418_v61  ;;  %443 = vmatprep.subr.bf16.mxu1 %v442_v11  ;;  %v226_v47 = vld [vmem:[#allocation5 + $0x158] sm:$0xff]  ;;  %v464_v48 = vpack.c.bf16 %v221_v45, %v219_v44  ;;  %v223_v50 = vld [vmem:[#allocation5 + $0x140] sm:$0xff]  ;;  %v225_v51 = vld [vmem:[#allocation5 + $0x150] sm:$0xff] }
  0x40   :  { %v466_v49 = vpack.c.bf16 %v226_v47, %v224_v46  ;;  %v228_v52 = vld [vmem:[#allocation5 + $0x168] sm:$0xff]  ;;  %v230_v53 = vld [vmem:[#allocation5 + $0x178] sm:$0xff]  ;;  %v468_v54 = vpack.c.bf16 %v225_v51, %v223_v50  ;;  %v227_v56 = vld [vmem:[#allocation5 + $0x160] sm:$0xff] }
  0x41   :  { %v470_v55 = vpack.c.bf16 %v230_v53, %v228_v52  ;;  %v229_v57 = vld [vmem:[#allocation5 + $0x170] sm:$0xff]  ;;  %v232_v59 = vld [vmem:[#allocation5 + $0x188] sm:$0xff]  ;;  %v234_v60 = vld [vmem:[#allocation5 + $0x198] sm:$0xff] }
  0x42   :  { %421 = vmatpush1.bf16.msra.mxu0 %v420_v6  ;;  %445 = vmatpush1.bf16.msra.mxu1 %v444_v17  ;;  %v472_v58 = vpack.c.bf16 %v229_v57, %v227_v56  ;;  %v474_v61 = vpack.c.bf16 %v234_v60, %v232_v59  ;;  %v231_v62 = vld [vmem:[#allocation5 + $0x180] sm:$0xff]  ;;  %v233_v63 = vld [vmem:[#allocation5 + $0x190] sm:$0xff]  ;;  %v236_v2 = vld [vmem:[#allocation5 + $0x1a8] sm:$0xff] }
  0x43   :  { %423 = vmatprep.subr.bf16.mxu0 %v422_v9  ;;  %447 = vmatprep.subr.bf16.mxu1 %v446_v18  ;;  %v476_v1 = vpack.c.bf16 %v233_v63, %v231_v62  ;;  %v238_v3 = vld [vmem:[#allocation5 + $0x1b8] sm:$0xff]  ;;  %v235_v5 = vld [vmem:[#allocation5 + $0x1a0] sm:$0xff]  ;;  %v237_v6 = vld [vmem:[#allocation5 + $0x1b0] sm:$0xff] }
  0x44   :  { %v478_v4 = vpack.c.bf16 %v238_v3, %v236_v2  ;;  %v480_v7 = vpack.c.bf16 %v237_v6, %v235_v5  ;;  %v240_v8 = vld [vmem:[#allocation5 + $0x1c8] sm:$0xff]  ;;  %v242_v9 = vld [vmem:[#allocation5 + $0x1d8] sm:$0xff]  ;;  %v239_v11 = vld [vmem:[#allocation5 + $0x1c0] sm:$0xff] }
  0x45   :  { %v482_v10 = vpack.c.bf16 %v242_v9, %v240_v8  ;;  %v241_v12 = vld [vmem:[#allocation5 + $0x1d0] sm:$0xff]  ;;  %v244_v14 = vld [vmem:[#allocation5 + $0x1e8] sm:$0xff]  ;;  %v246_v15 = vld [vmem:[#allocation5 + $0x1f8] sm:$0xff] }
  0x46   :  { %425 = vmatpush1.bf16.msra.mxu0 %v424_v16  ;;  %449 = vmatpush1.bf16.msra.mxu1 %v448_v24  ;;  %v484_v13 = vpack.c.bf16 %v241_v12, %v239_v11  ;;  %v243_v16 = vld [vmem:[#allocation5 + $0x1e0] sm:$0xff]  ;;  %v486_v17 = vpack.c.bf16 %v246_v15, %v244_v14  ;;  %v245_v18 = vld [vmem:[#allocation5 + $0x1f0] sm:$0xff] }
  0x47   :  { %451 = vmatprep.subr.bf16.mxu1 %v450_v25  ;;  %v488_v19 = vpack.c.bf16 %v245_v18, %v243_v16  ;;  %v90_v24 = vld [vmem:[%s702_s3] sm:$0x3]  ;;  %v98_v25 = vsub.s32 1, %v93_v21 }
  0x48   :  { %v95_v26 = vrot.slane %v90_v24, %v94_v22  ;;  %v56_v40 = vld [vmem:[%s700_s1] sm:$0x1]  ;;  %s587_s1 = smov [#allocation7]  }
  0x49   :  { %167 = vmatmul.mubr.f32.vlgmr.msra.gmra.mrb[0].mxu0 %v658_v23  ;;  %v99_v27 = vrot.slane %v90_v24, %v98_v25  ;;  %v247_v41 = vld [vmem:[%s704_s5] sm:$0x3]  ;;  %v340_v56 = vrot.slane %v56_v40, %v94_v22  ;;  %s377_s5 = sshll.u32 %s587_s1, 4  ;;  %s378_s5 = int_to_ptr.vmem [resolvable:$true] %s377_s5 }
  0x4a   :  { %172 = vmatprep.mubr.f32.mxu0 %v586_v0  ;;  %453 = vmatpush1.bf16.msra.mxu1 %v452_v31  ;;  %v215_v0 = vld [vmem:[#allocation5 + $0x100] sm:$0xff]  ;;  %s554_s10 = scalar_lea.vmem %s378_s5, 256  ;;  %p559_p3 = scmp.lt.s32.totalorder %s378_s5, %s378_s5 }
  0x4b   :  { %455 = vmatprep.subr.bf16.mxu1 %v454_v32  ;;  %v460_v42 = vpack.c.bf16 %v217_v39, %v215_v0  ;;  %v342_v60 = vmul.f32 %v340_v56, %v658_v23  ;;  %v343_v3 = vmul.f32 %v340_v56, %v665_v30  ;;  %p555_p2 = scmp.ne.s32.totalorder %s378_s5, %s554_s10  ;;  %p560_p4 = scmp.lt.s32.totalorder %s554_s10, %s554_s10 }
  0x4d   :  { %173 = vmatmul.mubr.f32.gmra.mrb[2].mxu0 %v665_v30  ;;  %p561_p5 = por %p560_p4, %p559_p3 }
  0x4e   :  { %457 = vmatpush1.bf16.msra.mxu1 %v456_v37 }
  0x4f   :  { %459 = vmatprep.subr.bf16.mxu1 %v458_v38  ;;  %p562_p6 = pnand %p561_p5, %p555_p2 }
  0x52   :  { %461 = vmatpush1.bf16.msra.mxu1 %v460_v42  ;;  %v57_v42 = vsub.f32 1.0, %v56_v40 }
  0x53   :  { %463 = vmatprep.subr.bf16.mxu1 %v462_v43  ;;  %v252_v43 = vrot.slane %v247_v41, %v94_v22 }
  0x54   :  { %v356_v44 = vrot.slane %v57_v42, %v94_v22 }
  0x56   :  { %465 = vmatpush1.bf16.msra.mxu1 %v464_v48 }
  0x57   :  { %467 = vmatprep.subr.bf16.mxu1 %v466_v49 }
  0x5a   :  { %469 = vmatpush1.bf16.msra.mxu1 %v468_v54 }
  0x5b   :  { %471 = vmatprep.subr.bf16.mxu1 %v470_v55  ;;  %v256_v55 = vrot.slane %v247_v41, %v98_v25 }
  0x5e   :  { %473 = vmatpush1.bf16.msra.mxu1 %v472_v58 }
  0x5f   :  { %475 = vmatprep.subr.bf16.mxu1 %v474_v61 }
  0x62   :  { %477 = vmatpush1.bf16.msra.mxu1 %v476_v1 }
  0x63   :  { %479 = vmatprep.subr.bf16.mxu1 %v478_v4 }
  0x66   :  { %481 = vmatpush1.bf16.msra.mxu1 %v480_v7 }
  0x67   :  { %483 = vmatprep.subr.bf16.mxu1 %v482_v10 }
  0x6a   :  { %485 = vmatpush1.bf16.msra.mxu1 %v484_v13 }
  0x6b   :  { %487 = vmatprep.subr.bf16.mxu1 %v486_v17 }
  0x6e   :  { %489 = vmatpush1.bf16.msra.mxu1 %v488_v19 }
 0x11c   :  { %v168_v28 = vpop.f32.mrb[0].mxu0 }
 0x11d   :  { %v169_v29 = vadd.f32 %v168_v28, %v95_v26  ;;  %v170_v31 = vpop.f32.mrb[1].mxu0 }
 0x11e   :  { %v171_v32 = vadd.f32 %v170_v31, %v99_v27 }
 0x120   :  { %498 = vtanh.f32 %v171_v32  ;;  %v174_v33 = vpop.f32.mrb[2].mxu0 }
 0x121   :  { %500 = vtanh.f32 %v169_v29  ;;  %v175_v34 = vadd.f32 %v174_v33, %v95_v26  ;;  %v176_v35 = vpop.f32.mrb[3].mxu0 }
 0x122   :  { %v177_v36 = vadd.f32 %v176_v35, %v99_v27 }
 0x124   :  { %502 = vtanh.f32 %v177_v36 }
 0x125   :  { %504 = vtanh.f32 %v175_v34 }
 0x12a   :  { %v499_v37 = vpop.eup %498 }
 0x12b   :  { %v501_v38 = vpop.eup %500  ;;  %323 = vmatprep.mubr.f32.mxu1 %v499_v37 }
 0x12c   :  { %324 = vmatmul.mubr.f32.vlgmr.msra.gmra.mrb[0].mxu1 %v501_v38 }
 0x12e   :  { %v503_v0 = vpop.eup %502 }
 0x12f   :  { %v505_v39 = vpop.eup %504  ;;  %329 = vmatprep.mubr.f32.mxu1 %v503_v0 }
 0x130   :  { %330 = vmatmul.mubr.f32.gmra.mrb[2].mxu1 %v505_v39 }
 0x1ff   :  { %v325_v45 = vpop.f32.mrb[0].mxu1 }
 0x200   :  { %v326_v46 = vadd.f32 %v325_v45, %v252_v43  ;;  %v327_v47 = vpop.f32.mrb[1].mxu1 }
 0x201   :  { %v328_v58 = vadd.f32 %v327_v47, %v256_v55 }
 0x202   :  { %v344_v48 = vmul.f32 1.442695, %v326_v46  ;;  %v364_v49 = vmul.f32 %v356_v44, %v326_v46 }
 0x203   :  { %v331_v50 = vpop.f32.mrb[2].mxu1 }
 0x204   :  { %506 = vpow2.f32 %v344_v48  ;;  %v332_v51 = vadd.f32 %v331_v50, %v252_v43  ;;  %v333_v52 = vpop.f32.mrb[3].mxu1  ;;  %366 = vadd.xlane.f32.xlu0 %v364_v49 }
 0x205   :  { %v334_v1 = vadd.f32 %v333_v52, %v256_v55 }
 0x206   :  { %v346_v53 = vmul.f32 1.442695, %v332_v51  ;;  %v365_v54 = vmul.f32 %v356_v44, %v332_v51 }
 0x208   :  { %508 = vpow2.f32 %v346_v53  ;;  %368 = vadd.xlane.f32.xlu0 %v365_v54 }
 0x20e   :  { %v507_v57 = vpop.eup %506 }
 0x20f   :  { %v348_v59 = vmul.f32 %v507_v57, %v658_v23 }
 0x211   :  { %v350_v61 = vadd.f32 %v348_v59, %v328_v58 }
 0x212   :  { %v509_v62 = vpop.eup %508 }
 0x213   :  { %v358_v63 = vmul.f32 %v356_v44, %v350_v61  ;;  %v349_v2 = vmul.f32 %v509_v62, %v665_v30 }
 0x215   :  { %v360_v4 = vadd.f32 %v358_v63, %v342_v60  ;;  %v351_v5 = vadd.f32 %v349_v2, %v334_v1 }
 0x217   :  { %362 = vst [vmem:[#allocation7] sm:$0xff] %v360_v4  ;;  %v359_v6 = vmul.f32 %v356_v44, %v351_v5 }
 0x219   :  { %v361_v7 = vadd.f32 %v359_v6, %v343_v3 }
 0x21b   :  { %363 = vst [vmem:[#allocation7 + $0x8] sm:$0xff] %v361_v7 }
 0x21c   :  { %565 = shalt.err (!%p562_p6)
}
 0x21d   :  { %s566_s13 = scalar_lea.hbm %s705_s6, 256 }
 0x21e   :  { %p567_p7 = scmp.ne.s32.totalorder %s705_s6, %s566_s13  ;;  %p570_p8 = scmp.lt.u32.totalorder %s566_s13, %s705_s6 }
 0x220   :  { %p572_p9 = pnand %p570_p8, %p567_p7 }
 0x222   :  { %575 = shalt.err (!%p572_p9)
}
 0x223   :  { %s588_s18 = smov 128   ;;  %s589_s19 = smov 8  }
 0x224   :  { %383 = dma.vmem_to_hbm [thread:$0]  %s378_s5, 256, %s705_s6, [#allocation4], %s588_s18, %s588_s18, %s589_s19  }
 0x291   :  { %v367_v23 = vpop.xlane.xlu0 %366 }
 0x292   :  { %370 = vst [vmem:[%s706_s7] sm:$0xff] %v367_v23 }
 0x295   :  { %v369_v30 = vpop.xlane.xlu0 %368 }
 0x296   :  { %371 = vst [vmem:[%s706_s7 + $0x8] sm:$0xff] %v369_v30 }
 0x297   :  { %580 = dma.done.wait [#allocation4], 256  }
 0x298   :  { %581 = vsyncadd [#allocation4], 4294967040 }
 0x299   :  { %391 = vsyncpa [#allocation3], 1 }
 0x29a   :  { %392 = vsyncpa [#allocation6], 1 }
 0x29b   :  { %393 = vsyncpa [#allocation4], 1 }

</bundles_post_ra>
